<compile_context>
chip_gen: v5e
topology: v5e:2x2
jax: 0.10.0
libtpu: 0.0.40
codegen_flags: <defaults>
</compile_context>

<pallas_src>
import functools

import jax
import jax.numpy as jnp
from jax.experimental import pallas as pl
from jax.experimental.pallas import tpu as pltpu


def _rup(v, m):
    return ((v + m - 1) // m) * m


def _to_bf16(v):
    """Widen int8 (storage dtype of unweighted A) via f32, pass bf16 through."""
    if v.dtype == jnp.bfloat16:
        return v
    return v.astype(jnp.float32).astype(jnp.bfloat16)


# --------------------------------------------------------------------------
# Kernels
# --------------------------------------------------------------------------
def _transform_kernel(dinv_ref, x_ref, w_ref, xw_ref):
    # XW = ((dinv ⊙ x) @ W) for one row block; computed once per layer.
    xs = (x_ref[...].astype(jnp.float32) * dinv_ref[...]).astype(jnp.bfloat16)
    xw_ref[...] = jnp.dot(
        xs, w_ref[...], preferred_element_type=jnp.float32
    ).astype(xw_ref.dtype)


def _agg_kernel(a_ref, dinv_ref, xw_ref, b_ref, out_ref, *, relu):
    # Pure A-streaming aggregation: out = dinv_row ⊙ (A_block @ XW) + b (+relu).
    a = _to_bf16(a_ref[...])                                    # (TM, Np)
    agg = jnp.dot(a, xw_ref[...], preferred_element_type=jnp.float32)
    out = agg * dinv_ref[...] + b_ref[...]
    if relu:
        out = jnp.maximum(out, 0.0)
    out_ref[...] = out.astype(out_ref.dtype)


def _fused_kernel(a_ref, dinv_ref, x_ref, w1_ref, b1_ref, w2_ref, b2_ref,
                  h_ref, z_ref):
    # Both layers in one kernel; A stays resident, h never leaves VMEM
    # except for the requested output.
    dinv = dinv_ref[...]                                        # (Np, 1) f32
    a = _to_bf16(a_ref[...])                                    # (Np, Np)

    xs = (x_ref[...] * dinv).astype(jnp.bfloat16)               # (Np, Fp)
    xw = jnp.dot(xs, w1_ref[...], preferred_element_type=jnp.float32)
    h = jnp.dot(a, xw.astype(jnp.bfloat16),
                preferred_element_type=jnp.float32) * dinv + b1_ref[...]
    h = jnp.maximum(h, 0.0)
    h_ref[...] = h.astype(h_ref.dtype)

    hs = (h * dinv).astype(jnp.bfloat16)
    hw = jnp.dot(hs, w2_ref[...], preferred_element_type=jnp.float32)
    z = jnp.dot(a, hw.astype(jnp.bfloat16),
                preferred_element_type=jnp.float32) * dinv + b2_ref[...]
    z_ref[...] = z.astype(z_ref.dtype)


# --------------------------------------------------------------------------
# pallas_call wrappers
# --------------------------------------------------------------------------
_VMEM_LIMIT = 48 * 1024 * 1024  # above 32 MiB scoped default, < v7x physical


def _gcn_transform(dinv, x, w, *, tm):
    """XW = ((dinv ⊙ x) @ W) as bf16, row-tiled over nodes."""
    npad, fpad = x.shape
    hpad = w.shape[1]
    grid = (npad // tm,)
    bytes_accessed = (x.size * x.dtype.itemsize + w.size * 2
                      + dinv.size * 4 + npad * hpad * 2)
    return pl.pallas_call(
        _transform_kernel,
        out_shape=jax.ShapeDtypeStruct((npad, hpad), jnp.bfloat16),
        grid=grid,
        in_specs=[
            pl.BlockSpec((tm, 1), lambda i: (i, 0)),        # dinv row block
            pl.BlockSpec((tm, fpad), lambda i: (i, 0)),     # x row block
            pl.BlockSpec((fpad, hpad), lambda i: (0, 0)),   # W (resident)
        ],
        out_specs=pl.BlockSpec((tm, hpad), lambda i: (i, 0)),
        compiler_params=pltpu.CompilerParams(
            dimension_semantics=("parallel",),
            vmem_limit_bytes=_VMEM_LIMIT),
        cost_estimate=pl.CostEstimate(
            flops=int(2 * npad * fpad * hpad), transcendentals=0,
            bytes_accessed=int(bytes_accessed)),
    )(dinv, x, w)


def _gcn_aggregate(a, dinv, xw, b, *, relu, out_dtype, tm):
    """dinv_row ⊙ ((A+I)_block @ XW) + b (+relu), row-tiled over output nodes."""
    npad = a.shape[0]
    hpad = xw.shape[1]
    grid = (npad // tm,)
    bytes_accessed = (a.size * a.dtype.itemsize + xw.size * 2 + dinv.size * 4
                      + b.size * 4 + npad * hpad * jnp.dtype(out_dtype).itemsize)
    return pl.pallas_call(
        functools.partial(_agg_kernel, relu=relu),
        out_shape=jax.ShapeDtypeStruct((npad, hpad), out_dtype),
        grid=grid,
        in_specs=[
            pl.BlockSpec((tm, npad), lambda i: (i, 0)),     # A+I row block (int8/bf16)
            pl.BlockSpec((tm, 1), lambda i: (i, 0)),        # dinv row block
            pl.BlockSpec((npad, hpad), lambda i: (0, 0)),   # XW (resident, bf16)
            pl.BlockSpec((1, hpad), lambda i: (0, 0)),      # bias
        ],
        out_specs=pl.BlockSpec((tm, hpad), lambda i: (i, 0)),
        compiler_params=pltpu.CompilerParams(
            dimension_semantics=("parallel",),
            vmem_limit_bytes=_VMEM_LIMIT),
        cost_estimate=pl.CostEstimate(
            flops=int(2 * npad * npad * hpad), transcendentals=0,
            bytes_accessed=int(bytes_accessed)),
    )(a, dinv, xw, b)


def _gcn_fused(a_p, dinv_p, x_p, w1_p, b1_p, w2_p, b2_p):
    """Both GCN layers in one pallas_call (small-graph path, A resident)."""
    npad = a_p.shape[0]
    fpad = x_p.shape[1]
    hpad = w1_p.shape[1]
    cpad = w2_p.shape[1]
    flops = 2 * npad * (fpad * hpad + npad * hpad + hpad * cpad + npad * cpad)
    bytes_accessed = (a_p.size * a_p.dtype.itemsize + x_p.size * 4
                      + w1_p.size * 2 + w2_p.size * 2
                      + npad * (hpad + cpad) * 4 + npad * 4)
    return pl.pallas_call(
        _fused_kernel,
        out_shape=(jax.ShapeDtypeStruct((npad, hpad), jnp.float32),
                   jax.ShapeDtypeStruct((npad, cpad), jnp.float32)),
        grid=(1,),
        in_specs=[
            pl.BlockSpec((npad, npad), lambda i: (0, 0)),
            pl.BlockSpec((npad, 1), lambda i: (0, 0)),
            pl.BlockSpec((npad, fpad), lambda i: (0, 0)),
            pl.BlockSpec((fpad, hpad), lambda i: (0, 0)),
            pl.BlockSpec((1, hpad), lambda i: (0, 0)),
            pl.BlockSpec((hpad, cpad), lambda i: (0, 0)),
            pl.BlockSpec((1, cpad), lambda i: (0, 0)),
        ],
        out_specs=(pl.BlockSpec((npad, hpad), lambda i: (0, 0)),
                   pl.BlockSpec((npad, cpad), lambda i: (0, 0))),
        compiler_params=pltpu.CompilerParams(
            dimension_semantics=("arbitrary",),
            vmem_limit_bytes=_VMEM_LIMIT),
        cost_estimate=pl.CostEstimate(
            flops=int(flops), transcendentals=0,
            bytes_accessed=int(bytes_accessed)),
    )(a_p, dinv_p, x_p, w1_p, b1_p, w2_p, b2_p)


# --------------------------------------------------------------------------
# Forward pass
# --------------------------------------------------------------------------
def _build_adjacency(n, edge_index, edge_weight=None):
    """Dense A+I (self loops weight 1) and D^{-1/2} (degree includes self loop)."""
    src, dst = edge_index[0], edge_index[1]
    ew = (jnp.ones(src.shape, jnp.float32) if edge_weight is None
          else edge_weight.astype(jnp.float32))
    a = jnp.zeros((n, n), jnp.float32).at[dst, src].add(ew)
    a = a + jnp.eye(n, dtype=jnp.float32)
    deg = jnp.sum(a, axis=1)
    dinv = jnp.where(deg > 0, jax.lax.rsqrt(deg), 0.0)
    return a, dinv


def gcn_forward(x, edge_index, params, edge_weight=None, *, tm=256,
                fuse_vmem_budget=16 * 1024 * 1024):
    """x: (N, F) f32; edge_index: (2, E) i32. Returns (h, z) like the module."""
    n, f = x.shape
    w1, b1, w2, b2 = params["w1"], params["b1"], params["w2"], params["b2"]
    hid, ncls = w1.shape[1], w2.shape[1]

    a, dinv = _build_adjacency(n, edge_index, edge_weight)
    # Unweighted A+I has small exact-integer entries -> int8 storage (widened
    # to bf16 in-kernel).  Weighted graphs keep bf16 (rounding as before).
    a_dtype = jnp.int8 if edge_weight is None else jnp.bfloat16

    # Pad lane dims to 128-multiples; round npad up to a tm multiple so the
    # row grid never drops trailing blocks when tm changes.
    fpad, hpad, cpad = _rup(f, 128), _rup(hid, 128), _rup(ncls, 128)
    npad = _rup(n, 128)
    tm = _rup(max(tm, 128), 128)
    tm = min(tm, npad)
    npad = _rup(npad, tm)

    a_p = jnp.zeros((npad, npad), jnp.float32).at[:n, :n].set(a).astype(a_dtype)
    dinv_p = jnp.zeros((npad, 1), jnp.float32).at[:n, 0].set(dinv)
    x_p = jnp.zeros((npad, fpad), jnp.float32).at[:n, :f].set(x)
    w1_p = jnp.zeros((fpad, hpad), jnp.float32).at[:f, :hid].set(w1).astype(jnp.bfloat16)
    b1_p = jnp.zeros((1, hpad), jnp.float32).at[:, :hid].set(b1.reshape(1, hid))
    w2_p = jnp.zeros((hpad, cpad), jnp.float32).at[:hid, :ncls].set(w2).astype(jnp.bfloat16)
    b2_p = jnp.zeros((1, cpad), jnp.float32).at[:, :ncls].set(b2.reshape(1, ncls))

    fused_bytes = (npad * npad * jnp.dtype(a_dtype).itemsize + npad * fpad * 4
                   + npad * (hpad + cpad) * 4 + fpad * hpad * 2 + hpad * cpad * 2)

    if fused_bytes <= fuse_vmem_budget:
        # Small-graph path: one kernel, A resident, no h HBM round trip.
        h_p, z_p = _gcn_fused(a_p, dinv_p, x_p, w1_p, b1_p, w2_p, b2_p)
        return h_p[:n, :hid], z_p[:n, :ncls]

    # General path: hoisted transform + A-streaming aggregation, per layer.
    xw1 = _gcn_transform(dinv_p, x_p, w1_p, tm=tm)                     # (Np,Hp) bf16
    h_p = _gcn_aggregate(a_p, dinv_p, xw1, b1_p, relu=True,
                         out_dtype=jnp.bfloat16, tm=tm)                # (Np,Hp) bf16
    xw2 = _gcn_transform(dinv_p, h_p, w2_p, tm=tm)                     # (Np,Cp) bf16
    z_p = _gcn_aggregate(a_p, dinv_p, xw2, b2_p, relu=False,
                         out_dtype=jnp.float32, tm=tm)                 # (Np,Cp) f32
    return h_p[:n, :hid].astype(jnp.float32), z_p[:n, :ncls]


def gcn_reference(x, edge_index, params, edge_weight=None):
    """Pure-JAX f32 reference of the same forward pass (for validation)."""
    n = x.shape[0]
    a, dinv = _build_adjacency(n, edge_index, edge_weight)
    a_hat = dinv[:, None] * a * dinv[None, :]
    h = jnp.maximum(a_hat @ (x @ params["w1"]) + params["b1"], 0.0)
    z = a_hat @ (h @ params["w2"]) + params["b2"]
    return h, z


def init_params(key, in_features, hidden, n_classes):
    k1, k2 = jax.random.split(key)
    lim1 = (6.0 / (in_features + hidden)) ** 0.5
    lim2 = (6.0 / (hidden + n_classes)) ** 0.5
    return {
        "w1": jax.random.uniform(k1, (in_features, hidden), jnp.float32, -lim1, lim1),
        "b1": jnp.zeros((1, hidden), jnp.float32),
        "w2": jax.random.uniform(k2, (hidden, n_classes), jnp.float32, -lim2, lim2),
        "b2": jnp.zeros((1, n_classes), jnp.float32),
    }


if __name__ == "__main__":
    key = jax.random.PRNGKey(0)
    kx, kp, kx2, kp2, ks, kd = jax.random.split(key, 6)

    # ---- Test 1: module-scale toy graph (fused single-kernel path) ----------
    N, F, HID, C = 8, 32, 16, 7
    x = jax.random.normal(kx, (N, F), dtype=jnp.float32)
    src = jnp.array([0, 1, 1, 2, 2, 3, 3, 4, 4, 5, 5, 6, 6, 7, 7, 0], jnp.int32)
    dst = jnp.array([1, 0, 2, 1, 3, 2, 4, 3, 5, 4, 6, 5, 7, 6, 0, 7], jnp.int32)
    edge_index = jnp.stack([src, dst], axis=0)
    params = init_params(kp, F, HID, C)

    h, z = gcn_forward(x, edge_index, params)
    jax.block_until_ready((h, z))
    h_ref, z_ref = gcn_reference(x, edge_index, params)

    assert h.shape == (N, HID) and z.shape == (N, C)
    assert bool(jnp.all(h >= 0.0))
    assert bool(jnp.allclose(h, h_ref, rtol=5e-2, atol=5e-2))
    assert bool(jnp.allclose(z, z_ref, rtol=5e-2, atol=5e-2))

    # ---- Test 2: larger graph exercising the tiled path (tm=256, grid>1) ----
    N2, F2 = 300, 96
    x2 = jax.random.normal(kx2, (N2, F2), dtype=jnp.float32)
    s2 = jax.random.randint(ks, (400,), 0, N2, dtype=jnp.int32)
    d2 = jax.random.randint(kd, (400,), 0, N2, dtype=jnp.int32)
    edge_index2 = jnp.stack([jnp.concatenate([s2, d2]),
                             jnp.concatenate([d2, s2])], axis=0)
    params2 = init_params(kp2, F2, HID, C)

    h2, z2 = gcn_forward(x2, edge_index2, params2, tm=256, fuse_vmem_budget=0)
    jax.block_until_ready((h2, z2))
    h2_ref, z2_ref = gcn_reference(x2, edge_index2, params2)

    assert h2.shape == (N2, HID) and z2.shape == (N2, C)
    assert bool(jnp.all(h2 >= 0.0))
    assert bool(jnp.allclose(h2, h2_ref, rtol=5e-2, atol=5e-2))
    assert bool(jnp.allclose(z2, z2_ref, rtol=5e-2, atol=5e-2))

    print("KERNEL_OK")
</pallas_src>

<mosaic_0001>
module attributes {stable_mosaic.version = 11 : i64} {
  func.func @_fused_kernel(%arg0: i32, %arg1: memref<128x128xi8, #tpu.memory_space<vmem>>, %arg2: memref<128x1xf32, #tpu.memory_space<vmem>>, %arg3: memref<128x128xf32, #tpu.memory_space<vmem>>, %arg4: memref<128x128xbf16, #tpu.memory_space<vmem>>, %arg5: memref<1x128xf32, #tpu.memory_space<vmem>>, %arg6: memref<128x128xbf16, #tpu.memory_space<vmem>>, %arg7: memref<1x128xf32, #tpu.memory_space<vmem>>, %arg8: memref<128x128xf32, #tpu.memory_space<vmem>>, %arg9: memref<128x128xf32, #tpu.memory_space<vmem>>) attributes {dimension_semantics = [#tpu.dimension_semantics<arbitrary>], iteration_bounds = array<i64: 1>, scalar_prefetch = 0 : i64, scratch_operands = 0 : i64, tpu.core_type = #tpu.core_type<tc>, window_params = [{pipeline_mode = #tpu.pipeline_mode<synchronous>, transform_indices = @transform_0, window_bounds = array<i64: 128, 128>}, {pipeline_mode = #tpu.pipeline_mode<synchronous>, transform_indices = @transform_1, window_bounds = array<i64: 128, 1>}, {pipeline_mode = #tpu.pipeline_mode<synchronous>, transform_indices = @transform_2, window_bounds = array<i64: 128, 128>}, {pipeline_mode = #tpu.pipeline_mode<synchronous>, transform_indices = @transform_3, window_bounds = array<i64: 128, 128>}, {pipeline_mode = #tpu.pipeline_mode<synchronous>, transform_indices = @transform_4, window_bounds = array<i64: 1, 128>}, {pipeline_mode = #tpu.pipeline_mode<synchronous>, transform_indices = @transform_5, window_bounds = array<i64: 128, 128>}, {pipeline_mode = #tpu.pipeline_mode<synchronous>, transform_indices = @transform_6, window_bounds = array<i64: 1, 128>}, {pipeline_mode = #tpu.pipeline_mode<synchronous>, transform_indices = @transform_7, window_bounds = array<i64: 128, 128>}, {pipeline_mode = #tpu.pipeline_mode<synchronous>, transform_indices = @transform_8, window_bounds = array<i64: 128, 128>}]} {
    %c0 = arith.constant 0 : index
    %c0_0 = arith.constant 0 : index
    %0 = vector.load %arg2[%c0, %c0_0] : memref<128x1xf32, #tpu.memory_space<vmem>>, vector<128x1xf32>
    %c0_1 = arith.constant 0 : index
    %c0_2 = arith.constant 0 : index
    %1 = vector.load %arg1[%c0_1, %c0_2] : memref<128x128xi8, #tpu.memory_space<vmem>>, vector<128x128xi8>
    %2 = arith.sitofp %1 : vector<128x128xi8> to vector<128x128xf32>
    %3 = arith.truncf %2 : vector<128x128xf32> to vector<128x128xbf16>
    %c0_3 = arith.constant 0 : index
    %c0_4 = arith.constant 0 : index
    %4 = vector.load %arg3[%c0_3, %c0_4] : memref<128x128xf32, #tpu.memory_space<vmem>>, vector<128x128xf32>
    %5 = vector.broadcast %0 : vector<128x1xf32> to vector<128x128xf32>
    %6 = arith.mulf %4, %5 : vector<128x128xf32>
    %7 = arith.truncf %6 : vector<128x128xf32> to vector<128x128xbf16>
    %c0_5 = arith.constant 0 : index
    %c0_6 = arith.constant 0 : index
    %8 = vector.load %arg4[%c0_5, %c0_6] : memref<128x128xbf16, #tpu.memory_space<vmem>>, vector<128x128xbf16>
    %cst = arith.constant dense<0.000000e+00> : vector<128x128xf32>
    %9 = tpu.matmul %7, %8, %cst {dimension_numbers = #tpu.dot_dimension_numbers<[1], [0], [0], [1], [0, 0, 1, 1], [], []>} : vector<128x128xbf16>, vector<128x128xbf16>, vector<128x128xf32> -> vector<128x128xf32>
    %10 = arith.truncf %9 : vector<128x128xf32> to vector<128x128xbf16>
    %cst_7 = arith.constant dense<0.000000e+00> : vector<128x128xf32>
    %11 = tpu.matmul %3, %10, %cst_7 {dimension_numbers = #tpu.dot_dimension_numbers<[1], [0], [0], [1], [0, 0, 1, 1], [], []>} : vector<128x128xbf16>, vector<128x128xbf16>, vector<128x128xf32> -> vector<128x128xf32>
    %12 = vector.broadcast %0 : vector<128x1xf32> to vector<128x128xf32>
    %13 = arith.mulf %11, %12 : vector<128x128xf32>
    %c0_8 = arith.constant 0 : index
    %c0_9 = arith.constant 0 : index
    %14 = vector.load %arg5[%c0_8, %c0_9] : memref<1x128xf32, #tpu.memory_space<vmem>>, vector<1x128xf32>
    %15 = vector.broadcast %14 : vector<1x128xf32> to vector<128x128xf32>
    %16 = arith.addf %13, %15 : vector<128x128xf32>
    %cst_10 = arith.constant 0.000000e+00 : f32
    %17 = vector.broadcast %cst_10 : f32 to vector<128x128xf32>
    %18 = arith.maximumf %16, %17 : vector<128x128xf32>
    %c0_11 = arith.constant 0 : index
    %c0_12 = arith.constant 0 : index
    %19 = vector.load %arg8[%c0_11, %c0_12] : memref<128x128xf32, #tpu.memory_space<vmem>>, vector<128x128xf32>
    tpu.vector_store %arg8[%c0_11, %c0_12], %18 {strides = array<i32>} : memref<128x128xf32, #tpu.memory_space<vmem>>, vector<128x128xf32>,
    %20 = vector.broadcast %0 : vector<128x1xf32> to vector<128x128xf32>
    %21 = arith.mulf %18, %20 : vector<128x128xf32>
    %22 = arith.truncf %21 : vector<128x128xf32> to vector<128x128xbf16>
    %c0_13 = arith.constant 0 : index
    %c0_14 = arith.constant 0 : index
    %23 = vector.load %arg6[%c0_13, %c0_14] : memref<128x128xbf16, #tpu.memory_space<vmem>>, vector<128x128xbf16>
    %cst_15 = arith.constant dense<0.000000e+00> : vector<128x128xf32>
    %24 = tpu.matmul %22, %23, %cst_15 {dimension_numbers = #tpu.dot_dimension_numbers<[1], [0], [0], [1], [0, 0, 1, 1], [], []>} : vector<128x128xbf16>, vector<128x128xbf16>, vector<128x128xf32> -> vector<128x128xf32>
    %25 = arith.truncf %24 : vector<128x128xf32> to vector<128x128xbf16>
    %cst_16 = arith.constant dense<0.000000e+00> : vector<128x128xf32>
    %26 = tpu.matmul %3, %25, %cst_16 {dimension_numbers = #tpu.dot_dimension_numbers<[1], [0], [0], [1], [0, 0, 1, 1], [], []>} : vector<128x128xbf16>, vector<128x128xbf16>, vector<128x128xf32> -> vector<128x128xf32>
    %27 = vector.broadcast %0 : vector<128x1xf32> to vector<128x128xf32>
    %28 = arith.mulf %26, %27 : vector<128x128xf32>
    %c0_17 = arith.constant 0 : index
    %c0_18 = arith.constant 0 : index
    %29 = vector.load %arg7[%c0_17, %c0_18] : memref<1x128xf32, #tpu.memory_space<vmem>>, vector<1x128xf32>
    %30 = vector.broadcast %29 : vector<1x128xf32> to vector<128x128xf32>
    %31 = arith.addf %28, %30 : vector<128x128xf32>
    %c0_19 = arith.constant 0 : index
    %c0_20 = arith.constant 0 : index
    %32 = vector.load %arg9[%c0_19, %c0_20] : memref<128x128xf32, #tpu.memory_space<vmem>>, vector<128x128xf32>
    tpu.vector_store %arg9[%c0_19, %c0_20], %31 {strides = array<i32>} : memref<128x128xf32, #tpu.memory_space<vmem>>, vector<128x128xf32>,
    return
  }
  func.func @transform_0(%arg0: i32) -> (i32, i32) {
    %c0_i32 = arith.constant 0 : i32
    %c0_i32_0 = arith.constant 0 : i32
    %c0_i32_1 = arith.constant 0 : i32
    return %c0_i32, %c0_i32_0 : i32, i32
  }
  func.func @transform_1(%arg0: i32) -> (i32, i32) {
    %c0_i32 = arith.constant 0 : i32
    %c0_i32_0 = arith.constant 0 : i32
    %c0_i32_1 = arith.constant 0 : i32
    return %c0_i32, %c0_i32_0 : i32, i32
  }
  func.func @transform_2(%arg0: i32) -> (i32, i32) {
    %c0_i32 = arith.constant 0 : i32
    %c0_i32_0 = arith.constant 0 : i32
    %c0_i32_1 = arith.constant 0 : i32
    return %c0_i32, %c0_i32_0 : i32, i32
  }
  func.func @transform_3(%arg0: i32) -> (i32, i32) {
    %c0_i32 = arith.constant 0 : i32
    %c0_i32_0 = arith.constant 0 : i32
    %c0_i32_1 = arith.constant 0 : i32
    return %c0_i32, %c0_i32_0 : i32, i32
  }
  func.func @transform_4(%arg0: i32) -> (i32, i32) {
    %c0_i32 = arith.constant 0 : i32
    %c0_i32_0 = arith.constant 0 : i32
    %c0_i32_1 = arith.constant 0 : i32
    return %c0_i32, %c0_i32_0 : i32, i32
  }
  func.func @transform_5(%arg0: i32) -> (i32, i32) {
    %c0_i32 = arith.constant 0 : i32
    %c0_i32_0 = arith.constant 0 : i32
    %c0_i32_1 = arith.constant 0 : i32
    return %c0_i32, %c0_i32_0 : i32, i32
  }
  func.func @transform_6(%arg0: i32) -> (i32, i32) {
    %c0_i32 = arith.constant 0 : i32
    %c0_i32_0 = arith.constant 0 : i32
    %c0_i32_1 = arith.constant 0 : i32
    return %c0_i32, %c0_i32_0 : i32, i32
  }
  func.func @transform_7(%arg0: i32) -> (i32, i32) {
    %c0_i32 = arith.constant 0 : i32
    %c0_i32_0 = arith.constant 0 : i32
    %c0_i32_1 = arith.constant 0 : i32
    return %c0_i32, %c0_i32_0 : i32, i32
  }
  func.func @transform_8(%arg0: i32) -> (i32, i32) {
    %c0_i32 = arith.constant 0 : i32
    %c0_i32_0 = arith.constant 0 : i32
    %c0_i32_1 = arith.constant 0 : i32
    return %c0_i32, %c0_i32_0 : i32, i32
  }
}

</mosaic_0001>

<bundles_post_ra>
// kernel: tpu_custom_call.1
= control target key start
LH: loop header
LB: loop body
LE: loop exit
PB: predicated region body
PF: predicated region fallthrough
CT: control target
= control target key end

     0   :  { %14 = vsyncpa [#allocation3], 0  ;;  %s1347_s0 = inlined_call_operand.hbm [shape: s8[128,128], index: 0, kind: input, shape index: {}]   ;;  %s1348_s1 = inlined_call_operand.vmem [shape: f32[128,1], index: 1, kind: input, shape index: {}]   ;;  %s1349_s2 = inlined_call_operand.vmem [shape: f32[128,128], index: 2, kind: input, shape index: {}]   ;;  %s1350_s3 = inlined_call_operand.hbm [shape: bf16[128,128], index: 3, kind: input, shape index: {}]   ;;  %s1351_s4 = inlined_call_operand.vmem [shape: f32[1,128], index: 4, kind: input, shape index: {}]   ;;  %s1352_s5 = inlined_call_operand.hbm [shape: bf16[128,128], index: 5, kind: input, shape index: {}]   ;;  %s1353_s6 = inlined_call_operand.vmem [shape: f32[1,128], index: 6, kind: input, shape index: {}]   ;;  %s1354_s7 = inlined_call_operand.hbm [shape: f32[128,128], index: 7, kind: output, shape index: {0}]   ;;  %s1355_s8 = inlined_call_operand.hbm [shape: f32[128,128], index: 8, kind: output, shape index: {1}]  }
   0x1   :  { %15 = vsyncpa [#allocation6], 0 }
   0x2   :  { %16 = vsyncpa [#allocation4], 0  ;;  %s39_s29 = sshll.u32 %s1350_s3, 4  ;;  %s40_s29 = int_to_ptr.hbm [resolvable:$true] %s39_s29 }
   0x3   :  { %17 = vsyncpa [#allocation10], 0  ;;  %s1002_s30 = smov [#allocation5]   ;;  %s22_s12 = sshll.u32 %s1347_s0, 4  ;;  %s23_s12 = int_to_ptr.hbm [resolvable:$true] %s22_s12 }
   0x4   :  { %s41_s9 = sshll.u32 %s1002_s30, 4  ;;  %s1003_s13 = smov 64   ;;  %s42_s9 = int_to_ptr.vmem [resolvable:$true] %s41_s9 }
   0x5   :  { %s1004_s14 = smov 4   ;;  %s1005_s15 = smov [#allocation2]  }
   0x6   :  { %47 = dma.hbm_to_vmem [thread:$0]  %s40_s29, 1024, %s42_s9, [#allocation6], %s1003_s13, %s1003_s13, %s1004_s14  }
   0x7   :  { %s24_s16 = sshll.u32 %s1005_s15, 4  ;;  %s1006_s17 = smov 128   ;;  %s25_s16 = int_to_ptr.vmem [resolvable:$true] %s24_s16 }
   0x8   :  { %s1007_s18 = smov 8   ;;  %s54_s20 = sshll.u32 %s1352_s5, 4  ;;  %s55_s20 = int_to_ptr.hbm [resolvable:$true] %s54_s20 }
   0x9   :  { %30 = dma.hbm_to_vmem [thread:$0]  %s23_s12, 512, %s25_s16, [#allocation3], %s1006_s17, %s1006_s17, %s1007_s18  }
   0xa   :  { %s1008_s21 = smov [#allocation7]  }
   0xb   :  { %s56_s0 = sshll.u32 %s1008_s21, 4  ;;  %s57_s0 = int_to_ptr.vmem [resolvable:$true] %s56_s0 }
   0xc   :  { %62 = dma.hbm_to_vmem [thread:$0]  %s55_s20, 1024, %s57_s0, [#allocation6], %s1003_s13, %s1003_s13, %s1004_s14  }
   0xd   :  { %994 = dma.done.wait [#allocation3], 512  }
   0xe   :  { %995 = vsyncadd [#allocation3], 4294966784 }
   0xf   :  { %996 = dma.done.wait [#allocation6], 2048  }
  0x10   :  { %997 = vsyncadd [#allocation6], 4294965248  ;;  %v1009_v0 = vmov 0   ;;  %v79_v1 = vld [vmem:[%s1348_s1 + $0x10] sm:$0xff]  ;;  %v77_v2 = vld [vmem:[%s1348_s1] sm:$0xff]  ;;  %s747_s20 = sshll.u32 %s1354_s7, 4  ;;  %s748_s20 = int_to_ptr.hbm [resolvable:$true] %s747_s20 }
  0x11   :  { %870 = vset.pattern.permute.xlu1 %v1009_v0  ;;  %869 = vset.pattern.permute.xlu0 %v1009_v0  ;;  %v81_v3 = vld [vmem:[%s1348_s1 + $0x20] sm:$0xff]  ;;  %v80_v4 = vld [vmem:[%s1348_s1 + $0x18] sm:$0xff]  ;;  %v78_v5 = vld [vmem:[%s1348_s1 + $0x8] sm:$0xff]  ;;  %s760_s24 = sshll.u32 %s1355_s8, 4  ;;  %s761_s24 = int_to_ptr.hbm [resolvable:$true] %s760_s24 }
  0x12   :  { %871 = vset.pattern.permute.xlu2 %v1009_v0  ;;  %165 = vperm.xlu1 %870, %v79_v1   ;;  %v82_v6 = vld [vmem:[%s1348_s1 + $0x28] sm:$0xff]  ;;  %v850_v7 = vld [vmem:[#allocation5 + $0x38] sm:$0xff]  ;;  %v849_v8 = vld [vmem:[#allocation5 + $0x30] sm:$0xff] }
  0x13   :  { %155 = vperm.xlu0 %869, %v77_v2   ;;  %175 = vperm.xlu2 %871, %v81_v3   ;;  %v84_v9 = vld [vmem:[%s1348_s1 + $0x38] sm:$0xff]  ;;  %v83_v10 = vld [vmem:[%s1348_s1 + $0x30] sm:$0xff]  ;;  %v848_v11 = vld [vmem:[#allocation5 + $0x28] sm:$0xff] }
  0x14   :  { %321 = vmatpush.bf16.msra.mxu0 %v850_v7  ;;  %v85_v12 = vld [vmem:[%s1348_s1 + $0x40] sm:$0xff]  ;;  %v87_v14 = vld [vmem:[%s1348_s1 + $0x50] sm:$0xff]  ;;  %v86_v15 = vld [vmem:[%s1348_s1 + $0x48] sm:$0xff] }
  0x15   :  { %v847_v13 = vld [vmem:[#allocation5 + $0x20] sm:$0xff]  ;;  %v846_v16 = vld [vmem:[#allocation5 + $0x18] sm:$0xff]  ;;  %v90_v18 = vld [vmem:[%s1348_s1 + $0x68] sm:$0xff] }
  0x16   :  { %v88_v17 = vld [vmem:[%s1348_s1 + $0x58] sm:$0xff]  ;;  %v89_v19 = vld [vmem:[%s1348_s1 + $0x60] sm:$0xff]  ;;  %v91_v20 = vld [vmem:[%s1348_s1 + $0x70] sm:$0xff] }
  0x17   :  { %v92_v21 = vld [vmem:[%s1348_s1 + $0x78] sm:$0xff]  ;;  %v845_v22 = vld [vmem:[#allocation5 + $0x10] sm:$0xff]  ;;  %v844_v23 = vld [vmem:[#allocation5 + $0x8] sm:$0xff] }
  0x18   :  { %322 = vmatpush.bf16.msra.mxu0 %v849_v8  ;;  %v843_v24 = vld [vmem:[#allocation5] sm:$0xff]  ;;  %v138_v27 = vld [vmem:[%s1349_s2 + $0x8] sm:$0xff]  ;;  %v139_v33 = vld [vmem:[%s1349_s2 + $0x10] sm:$0xff] }
  0x19   :  { %v137_v26 = vld [vmem:[%s1349_s2] sm:$0xff]  ;;  %v140_v34 = vld [vmem:[%s1349_s2 + $0x18] sm:$0xff]  ;;  %v142_v41 = vld [vmem:[%s1349_s2 + $0x28] sm:$0xff] }
  0x1a   :  { %170 = vperm.xlu1 %870, %v80_v4   ;;  %v141_v40 = vld [vmem:[%s1349_s2 + $0x20] sm:$0xff]  ;;  %v143_v48 = vld [vmem:[%s1349_s2 + $0x30] sm:$0xff]  ;;  %v144_v49 = vld [vmem:[%s1349_s2 + $0x38] sm:$0xff] }
  0x1b   :  { %160 = vperm.xlu0 %869, %v78_v5   ;;  %180 = vperm.xlu2 %871, %v82_v6   ;;  %v145_v54 = vld [vmem:[%s1349_s2 + $0x40] sm:$0xff]  ;;  %v146_v55 = vld [vmem:[%s1349_s2 + $0x48] sm:$0xff]  ;;  %v147_v62 = vld [vmem:[%s1349_s2 + $0x50] sm:$0xff] }
  0x1c   :  { %323 = vmatpush.bf16.msra.mxu0 %v848_v11  ;;  %v148_v63 = vld [vmem:[%s1349_s2 + $0x58] sm:$0xff]  ;;  %v149_v5 = vld [vmem:[%s1349_s2 + $0x60] sm:$0xff]  ;;  %v150_v6 = vld [vmem:[%s1349_s2 + $0x68] sm:$0xff] }
  0x1d   :  { %v152_v11 = vld [vmem:[%s1349_s2 + $0x78] sm:$0xff] }
  0x20   :  { %324 = vmatpush.bf16.msra.mxu0 %v847_v13  ;;  %v151_v13 = vld [vmem:[%s1349_s2 + $0x70] sm:$0xff] }
  0x22   :  { %190 = vperm.xlu1 %870, %v84_v9  }
  0x23   :  { %185 = vperm.xlu0 %869, %v83_v10   ;;  %195 = vperm.xlu2 %871, %v85_v12  }
  0x24   :  { %325 = vmatpush.bf16.msra.mxu0 %v846_v16 }
  0x28   :  { %326 = vmatpush.bf16.msra.mxu0 %v845_v22 }
  0x2a   :  { %205 = vperm.xlu1 %870, %v87_v14  }
  0x2b   :  { %200 = vperm.xlu0 %869, %v86_v15   ;;  %210 = vperm.xlu2 %871, %v88_v17  }
  0x2c   :  { %327 = vmatpush.bf16.msra.mxu0 %v844_v23 }
  0x30   :  { %328 = vmatpush.bf16.msra.mxu0 %v843_v24 }
  0x32   :  { %220 = vperm.xlu1 %870, %v90_v18  }
  0x33   :  { %215 = vperm.xlu0 %869, %v89_v19   ;;  %225 = vperm.xlu2 %871, %v91_v20  }
  0x3b   :  { %230 = vperm.xlu0 %869, %v92_v21  }
  0x6d   :  { %v1141_v39 = vpop.permute.xlu2 %175 }
  0x6e   :  { %v237_v43 = vmul.f32 %v1141_v39, %v141_v40 }
  0x75   :  { %v1149_v42 = vpop.permute.xlu2 %180 }
  0x76   :  { %v238_v44 = vmul.f32 %v1149_v42, %v142_v41 }
  0x78   :  { %v251_v45 = vpack.c.bf16 %v238_v44, %v237_v43 }
  0x7d   :  { %v1173_v56 = vpop.permute.xlu2 %195 }
  0x7e   :  { %v241_v57 = vmul.f32 %v1173_v56, %v145_v54 }
  0x84   :  { %v1129_v32 = vpop.permute.xlu1 %165 }
  0x85   :  { %v1117_v25 = vpop.permute.xlu0 %155  ;;  %v235_v36 = vmul.f32 %v1129_v32, %v139_v33  ;;  %v1177_v60 = vpop.permute.xlu2 %210 }
  0x86   :  { %v233_v29 = vmul.f32 %v1117_v25, %v137_v26  ;;  %v244_v1 = vmul.f32 %v1177_v60, %v148_v63 }
  0x8c   :  { %v1137_v35 = vpop.permute.xlu1 %170 }
  0x8d   :  { %v1125_v28 = vpop.permute.xlu0 %160  ;;  %v236_v37 = vmul.f32 %v1137_v35, %v140_v34  ;;  %v1206_v12 = vpop.permute.xlu2 %225 }
  0x8e   :  { %v234_v30 = vmul.f32 %v1125_v28, %v138_v27  ;;  %v247_v15 = vmul.f32 %v1206_v12, %v151_v13 }
  0x8f   :  { %v250_v38 = vpack.c.bf16 %v236_v37, %v235_v36 }
  0x90   :  { %v249_v31 = vpack.c.bf16 %v234_v30, %v233_v29 }
  0x92   :  { %329 = vmatmul.bf16.vlgmr.msra.gmra.mxu0 %v249_v31 }
  0x94   :  { %v1153_v46 = vpop.permute.xlu1 %190 }
  0x95   :  { %v1155_v47 = vpop.permute.xlu0 %185  ;;  %v240_v51 = vmul.f32 %v1153_v46, %v144_v49  ;;  %v93_v49 = vld [vmem:[#allocation2] sm:$0xff] }
  0x96   :  { %v239_v50 = vmul.f32 %v1155_v47, %v143_v48 }
  0x98   :  { %v252_v52 = vpack.c.bf16 %v240_v51, %v239_v50  ;;  %v97_v50 = vunpack.c.0.s8 %v93_v49  ;;  %v98_v51 = vunpack.c.1.s8 %v93_v49 }
  0x9a   :  { %v114_v54 = vcvt.s32.f32 %v98_v51  ;;  %v851_v51 = vld [vmem:[#allocation7] sm:$0xff] }
  0x9c   :  { %v1179_v61 = vpop.permute.xlu1 %205 }
  0x9d   :  { %v1165_v53 = vpop.permute.xlu0 %200  ;;  %v243_v0 = vmul.f32 %v1179_v61, %v147_v62 }
  0x9e   :  { %v242_v58 = vmul.f32 %v1165_v53, %v146_v55 }
  0x9f   :  { %v254_v2 = vpack.c.bf16 %v244_v1, %v243_v0  ;;  %v94_v0 = vld [vmem:[#allocation2 + $0x8] sm:$0xff] }
  0xa0   :  { %v253_v59 = vpack.c.bf16 %v242_v58, %v241_v57  ;;  %v99_v57 = vunpack.c.2.s8 %v93_v49  ;;  %v100_v58 = vunpack.c.3.s8 %v93_v49  ;;  %v101_v1 = vunpack.c.0.s8 %v94_v0 }
  0xa2   :  { %334 = vmatmul.bf16.gmra.mxu0 %v250_v38  ;;  %v116_v62 = vcvt.s32.f32 %v100_v58 }
  0xa4   :  { %v1189_v3 = vpop.permute.xlu1 %220 }
  0xa5   :  { %v1191_v4 = vpop.permute.xlu0 %215  ;;  %v246_v8 = vmul.f32 %v1189_v3, %v150_v6 }
  0xa6   :  { %v245_v7 = vmul.f32 %v1191_v4, %v149_v5  ;;  %v117_v5 = vcvt.s32.f32 %v101_v1 }
  0xa8   :  { %v255_v9 = vpack.c.bf16 %v246_v8, %v245_v7  ;;  %v103_v8 = vunpack.c.2.s8 %v94_v0 }
  0xad   :  { %v1201_v10 = vpop.permute.xlu0 %230 }
  0xae   :  { %v248_v14 = vmul.f32 %v1201_v10, %v152_v11  ;;  %v119_v11 = vcvt.s32.f32 %v103_v8 }
  0xb0   :  { %v256_v16 = vpack.c.bf16 %v248_v14, %v247_v15  ;;  %v95_v15 = vld [vmem:[#allocation2 + $0x10] sm:$0xff] }
  0xb2   :  { %339 = vmatmul.bf16.gmra.mxu0 %v251_v45 }
  0xc2   :  { %344 = vmatmul.bf16.gmra.mxu0 %v252_v52  ;;  %v113_v52 = vcvt.s32.f32 %v97_v50 }
  0xc4   :  { %v1213_v55 = vpack.c.bf16 %v114_v54, %v113_v52  ;;  %v1240_v54 = vld [vmem:[%s1351_s4] ss:$0 sm:$0xff]  ;;  %s1010_s4 = smov [#allocation8]  }
  0xc5   :  { %s745_s16 = sshll.u32 %s1010_s4, 4  ;;  %s746_s16 = int_to_ptr.vmem [resolvable:$true] %s745_s16 }
  0xd2   :  { %349 = vmatmul.bf16.gmra.mxu0 %v253_v59  ;;  %v115_v59 = vcvt.s32.f32 %v99_v57 }
  0xd4   :  { %v1216_v63 = vpack.c.bf16 %v116_v62, %v115_v59 }
  0xe2   :  { %354 = vmatmul.bf16.gmra.mxu0 %v254_v2  ;;  %v102_v2 = vunpack.c.1.s8 %v94_v0 }
  0xe4   :  { %v118_v6 = vcvt.s32.f32 %v102_v2 }
  0xe6   :  { %v1219_v7 = vpack.c.bf16 %v118_v6, %v117_v5 }
  0xf2   :  { %359 = vmatmul.bf16.gmra.mxu0 %v255_v9  ;;  %v104_v9 = vunpack.c.3.s8 %v94_v0 }
  0xf4   :  { %v120_v13 = vcvt.s32.f32 %v104_v9 }
  0xf6   :  { %v1222_v14 = vpack.c.bf16 %v120_v13, %v119_v11 }
 0x102   :  { %364 = vmatmul.bf16.gmra.mxu0 %v256_v16  ;;  %v105_v16 = vunpack.c.0.s8 %v95_v15 }
 0x10f   :  { %v330_v17 = vpop.f32.mrf.mxu0 }
 0x117   :  { %v332_v18 = vpop.f32.mrf.mxu0 }
 0x118   :  { %v370_v19 = vpack.c.bf16 %v332_v18, %v330_v17  ;;  %v106_v17 = vunpack.c.1.s8 %v95_v15  ;;  %v121_v18 = vcvt.s32.f32 %v105_v16 }
 0x11f   :  { %v335_v20 = vpop.f32.mrf.mxu0 }
 0x127   :  { %v337_v21 = vpop.f32.mrf.mxu0 }
 0x128   :  { %v371_v22 = vpack.c.bf16 %v337_v21, %v335_v20  ;;  %v107_v21 = vunpack.c.2.s8 %v95_v15 }
 0x12f   :  { %v340_v23 = vpop.f32.mrf.mxu0 }
 0x137   :  { %v342_v24 = vpop.f32.mrf.mxu0 }
 0x138   :  { %v372_v26 = vpack.c.bf16 %v342_v24, %v340_v23  ;;  %v123_v23 = vcvt.s32.f32 %v107_v21 }
 0x13f   :  { %v345_v27 = vpop.f32.mrf.mxu0 }
 0x147   :  { %v347_v29 = vpop.f32.mrf.mxu0 }
 0x148   :  { %v373_v30 = vpack.c.bf16 %v347_v29, %v345_v27  ;;  %v858_v27 = vld [vmem:[#allocation7 + $0x38] sm:$0xff] }
 0x149   :  { %v96_v29 = vld [vmem:[#allocation2 + $0x18] sm:$0xff]  ;;  %583 = vmatpush.bf16.msra.mxu2 %v858_v27 }
 0x14f   :  { %v350_v31 = vpop.f32.mrf.mxu0 }
 0x157   :  { %v352_v33 = vpop.f32.mrf.mxu0 }
 0x158   :  { %v374_v48 = vpack.c.bf16 %v352_v33, %v350_v31  ;;  %v109_v31 = vunpack.c.0.s8 %v96_v29  ;;  %v110_v33 = vunpack.c.1.s8 %v96_v29 }
 0x15f   :  { %v355_v34 = vpop.f32.mrf.mxu0 }
 0x167   :  { %v357_v36 = vpop.f32.mrf.mxu0 }
 0x168   :  { %v375_v45 = vpack.c.bf16 %v357_v36, %v355_v34  ;;  %v856_v34 = vld [vmem:[#allocation7 + $0x28] sm:$0xff]  ;;  %v125_v36 = vcvt.s32.f32 %v109_v31 }
 0x16f   :  { %v360_v37 = vpop.f32.mrf.mxu0 }
 0x177   :  { %v362_v38 = vpop.f32.mrf.mxu0 }
 0x178   :  { %v376_v44 = vpack.c.bf16 %v362_v38, %v360_v37  ;;  %v126_v37 = vcvt.s32.f32 %v110_v33  ;;  %v855_v38 = vld [vmem:[#allocation7 + $0x20] sm:$0xff] }
 0x17f   :  { %v365_v40 = vpop.f32.mrf.mxu0 }
 0x187   :  { %v367_v41 = vpop.f32.mrf.mxu0 }
 0x188   :  { %v377_v43 = vpack.c.bf16 %v367_v41, %v365_v40  ;;  %v1231_v40 = vpack.c.bf16 %v126_v37, %v125_v36  ;;  %v854_v41 = vld [vmem:[#allocation7 + $0x18] sm:$0xff] }
 0x18a   :  { %378 = vmatpush.bf16.msra.mxu1 %v377_v43  ;;  %v853_v43 = vld [vmem:[#allocation7 + $0x10] sm:$0xff] }
 0x18e   :  { %379 = vmatpush.bf16.msra.mxu1 %v376_v44  ;;  %v111_v44 = vunpack.c.2.s8 %v96_v29 }
 0x190   :  { %v127_v49 = vcvt.s32.f32 %v111_v44 }
 0x192   :  { %380 = vmatpush.bf16.msra.mxu1 %v375_v45  ;;  %v112_v45 = vunpack.c.3.s8 %v96_v29 }
 0x194   :  { %v128_v50 = vcvt.s32.f32 %v112_v45 }
 0x196   :  { %381 = vmatpush.bf16.msra.mxu1 %v374_v48  ;;  %v852_v48 = vld [vmem:[#allocation7 + $0x8] sm:$0xff]  ;;  %v1234_v52 = vpack.c.bf16 %v128_v50, %v127_v49 }
 0x19a   :  { %382 = vmatpush.bf16.msra.mxu1 %v373_v30  ;;  %v857_v30 = vld [vmem:[#allocation7 + $0x30] sm:$0xff] }
 0x19b   :  { %584 = vmatpush.bf16.msra.mxu2 %v857_v30 }
 0x19e   :  { %383 = vmatpush.bf16.msra.mxu1 %v372_v26 }
 0x19f   :  { %585 = vmatpush.bf16.msra.mxu2 %v856_v34 }
 0x1a2   :  { %384 = vmatpush.bf16.msra.mxu1 %v371_v22  ;;  %v108_v22 = vunpack.c.3.s8 %v95_v15 }
 0x1a3   :  { %586 = vmatpush.bf16.msra.mxu2 %v855_v38 }
 0x1a4   :  { %v124_v24 = vcvt.s32.f32 %v108_v22 }
 0x1a6   :  { %385 = vmatpush.bf16.msra.mxu1 %v370_v19  ;;  %v122_v19 = vcvt.s32.f32 %v106_v17  ;;  %v1228_v26 = vpack.c.bf16 %v124_v24, %v123_v23 }
 0x1a7   :  { %587 = vmatpush.bf16.msra.mxu2 %v854_v41 }
 0x1a8   :  { %v1225_v20 = vpack.c.bf16 %v122_v19, %v121_v18 }
 0x1a9   :  { %386 = vmatmul.bf16.vlgmr.msra.gmra.mxu1 %v1213_v55 }
 0x1ab   :  { %588 = vmatpush.bf16.msra.mxu2 %v853_v43 }
 0x1af   :  { %589 = vmatpush.bf16.msra.mxu2 %v852_v48 }
 0x1b3   :  { %590 = vmatpush.bf16.msra.mxu2 %v851_v51 }
 0x1b9   :  { %391 = vmatmul.bf16.gmra.mxu1 %v1216_v63 }
 0x1c9   :  { %396 = vmatmul.bf16.gmra.mxu1 %v1219_v7 }
 0x1d9   :  { %401 = vmatmul.bf16.gmra.mxu1 %v1222_v14 }
 0x1e9   :  { %406 = vmatmul.bf16.gmra.mxu1 %v1225_v20 }
 0x1f9   :  { %411 = vmatmul.bf16.gmra.mxu1 %v1228_v26 }
 0x209   :  { %416 = vmatmul.bf16.gmra.mxu1 %v1231_v40 }
 0x219   :  { %421 = vmatmul.bf16.gmra.mxu1 %v1234_v52 }
 0x226   :  { %v387_v57 = vpop.f32.mrf.mxu1 }
 0x227   :  { %v427_v58 = vmul.f32 %v387_v57, %v1117_v25 }
 0x229   :  { %v447_v59 = vadd.f32 %v1240_v54, %v427_v58 }
 0x22b   :  { %v463_v62 = vmax.f32 %v447_v59, 0.0 }
 0x22d   :  { %479 = vst [vmem:[#allocation8] sm:$0xff] %v463_v62  ;;  %v495_v6 = vmul.f32 %v463_v62, %v1117_v25 }
 0x22e   :  { %v389_v0 = vpop.f32.mrf.mxu1 }
 0x22f   :  { %v428_v1 = vmul.f32 %v389_v0, %v1125_v28 }
 0x231   :  { %v448_v2 = vadd.f32 %v1240_v54, %v428_v1 }
 0x233   :  { %v464_v5 = vmax.f32 %v448_v2, 0.0 }
 0x235   :  { %480 = vst [vmem:[#allocation8 + $0x8] sm:$0xff] %v464_v5  ;;  %v496_v8 = vmul.f32 %v464_v5, %v1125_v28 }
 0x236   :  { %v392_v9 = vpop.f32.mrf.mxu1 }
 0x237   :  { %v429_v11 = vmul.f32 %v392_v9, %v1129_v32  ;;  %v511_v13 = vpack.c.bf16 %v496_v8, %v495_v6 }
 0x239   :  { %v449_v15 = vadd.f32 %v1240_v54, %v429_v11  ;;  %591 = vmatmul.bf16.vlgmr.msra.gmra.mxu2 %v511_v13 }
 0x23b   :  { %v465_v16 = vmax.f32 %v449_v15, 0.0 }
 0x23d   :  { %481 = vst [vmem:[#allocation8 + $0x10] sm:$0xff] %v465_v16  ;;  %v497_v22 = vmul.f32 %v465_v16, %v1129_v32 }
 0x23e   :  { %v394_v17 = vpop.f32.mrf.mxu1 }
 0x23f   :  { %v430_v18 = vmul.f32 %v394_v17, %v1137_v35 }
 0x241   :  { %v450_v19 = vadd.f32 %v1240_v54, %v430_v18 }
 0x243   :  { %v466_v21 = vmax.f32 %v450_v19, 0.0 }
 0x245   :  { %482 = vst [vmem:[#allocation8 + $0x18] sm:$0xff] %v466_v21  ;;  %v498_v23 = vmul.f32 %v466_v21, %v1137_v35 }
 0x246   :  { %v397_v24 = vpop.f32.mrf.mxu1 }
 0x247   :  { %v431_v27 = vmul.f32 %v397_v24, %v1141_v39  ;;  %v512_v29 = vpack.c.bf16 %v498_v23, %v497_v22 }
 0x249   :  { %v451_v30 = vadd.f32 %v1240_v54, %v431_v27  ;;  %596 = vmatmul.bf16.gmra.mxu2 %v512_v29 }
 0x24b   :  { %v467_v31 = vmax.f32 %v451_v30, 0.0 }
 0x24d   :  { %483 = vst [vmem:[#allocation8 + $0x20] sm:$0xff] %v467_v31  ;;  %v499_v38 = vmul.f32 %v467_v31, %v1141_v39 }
 0x24e   :  { %v399_v33 = vpop.f32.mrf.mxu1 }
 0x24f   :  { %v432_v34 = vmul.f32 %v399_v33, %v1149_v42 }
 0x251   :  { %v452_v36 = vadd.f32 %v1240_v54, %v432_v34 }
 0x253   :  { %v468_v37 = vmax.f32 %v452_v36, 0.0 }
 0x255   :  { %484 = vst [vmem:[#allocation8 + $0x28] sm:$0xff] %v468_v37  ;;  %v500_v41 = vmul.f32 %v468_v37, %v1149_v42 }
 0x256   :  { %v402_v43 = vpop.f32.mrf.mxu1 }
 0x257   :  { %v433_v44 = vmul.f32 %v402_v43, %v1155_v47  ;;  %v513_v45 = vpack.c.bf16 %v500_v41, %v499_v38 }
 0x259   :  { %v453_v48 = vadd.f32 %v1240_v54, %v433_v44  ;;  %601 = vmatmul.bf16.gmra.mxu2 %v513_v45 }
 0x25b   :  { %v469_v49 = vmax.f32 %v453_v48, 0.0 }
 0x25d   :  { %485 = vst [vmem:[#allocation8 + $0x30] sm:$0xff] %v469_v49  ;;  %v501_v59 = vmul.f32 %v469_v49, %v1155_v47 }
 0x25e   :  { %v404_v50 = vpop.f32.mrf.mxu1 }
 0x25f   :  { %v434_v51 = vmul.f32 %v404_v50, %v1153_v46 }
 0x261   :  { %v454_v57 = vadd.f32 %v1240_v54, %v434_v51 }
 0x263   :  { %v470_v58 = vmax.f32 %v454_v57, 0.0 }
 0x265   :  { %486 = vst [vmem:[#allocation8 + $0x38] sm:$0xff] %v470_v58  ;;  %v502_v62 = vmul.f32 %v470_v58, %v1153_v46 }
 0x266   :  { %v407_v0 = vpop.f32.mrf.mxu1 }
 0x267   :  { %v435_v1 = vmul.f32 %v407_v0, %v1173_v56  ;;  %v514_v2 = vpack.c.bf16 %v502_v62, %v501_v59 }
 0x269   :  { %v455_v5 = vadd.f32 %v1240_v54, %v435_v1  ;;  %606 = vmatmul.bf16.gmra.mxu2 %v514_v2 }
 0x26b   :  { %v471_v6 = vmax.f32 %v455_v5, 0.0 }
 0x26d   :  { %487 = vst [vmem:[#allocation8 + $0x40] sm:$0xff] %v471_v6  ;;  %v503_v15 = vmul.f32 %v471_v6, %v1173_v56 }
 0x26e   :  { %v409_v8 = vpop.f32.mrf.mxu1 }
 0x26f   :  { %v436_v9 = vmul.f32 %v409_v8, %v1165_v53 }
 0x271   :  { %v456_v11 = vadd.f32 %v1240_v54, %v436_v9 }
 0x273   :  { %v472_v13 = vmax.f32 %v456_v11, 0.0 }
 0x275   :  { %488 = vst [vmem:[#allocation8 + $0x48] sm:$0xff] %v472_v13  ;;  %v504_v16 = vmul.f32 %v472_v13, %v1165_v53 }
 0x276   :  { %v412_v17 = vpop.f32.mrf.mxu1 }
 0x277   :  { %v437_v18 = vmul.f32 %v412_v17, %v1179_v61  ;;  %v515_v19 = vpack.c.bf16 %v504_v16, %v503_v15 }
 0x279   :  { %v457_v21 = vadd.f32 %v1240_v54, %v437_v18  ;;  %611 = vmatmul.bf16.gmra.mxu2 %v515_v19 }
 0x27b   :  { %v473_v22 = vmax.f32 %v457_v21, 0.0 }
 0x27d   :  { %489 = vst [vmem:[#allocation8 + $0x50] sm:$0xff] %v473_v22  ;;  %v505_v30 = vmul.f32 %v473_v22, %v1179_v61 }
 0x27e   :  { %v414_v23 = vpop.f32.mrf.mxu1 }
 0x27f   :  { %v438_v24 = vmul.f32 %v414_v23, %v1177_v60 }
 0x281   :  { %v458_v27 = vadd.f32 %v1240_v54, %v438_v24 }
 0x283   :  { %v474_v29 = vmax.f32 %v458_v27, 0.0 }
 0x285   :  { %490 = vst [vmem:[#allocation8 + $0x58] sm:$0xff] %v474_v29  ;;  %v506_v31 = vmul.f32 %v474_v29, %v1177_v60 }
 0x286   :  { %v417_v33 = vpop.f32.mrf.mxu1 }
 0x287   :  { %v439_v34 = vmul.f32 %v417_v33, %v1191_v4  ;;  %v516_v36 = vpack.c.bf16 %v506_v31, %v505_v30 }
 0x289   :  { %v459_v37 = vadd.f32 %v1240_v54, %v439_v34  ;;  %616 = vmatmul.bf16.gmra.mxu2 %v516_v36 }
 0x28b   :  { %v475_v38 = vmax.f32 %v459_v37, 0.0 }
 0x28d   :  { %491 = vst [vmem:[#allocation8 + $0x60] sm:$0xff] %v475_v38  ;;  %v507_v48 = vmul.f32 %v475_v38, %v1191_v4 }
 0x28e   :  { %v419_v41 = vpop.f32.mrf.mxu1 }
 0x28f   :  { %v440_v43 = vmul.f32 %v419_v41, %v1189_v3 }
 0x291   :  { %v460_v44 = vadd.f32 %v1240_v54, %v440_v43 }
 0x293   :  { %v476_v45 = vmax.f32 %v460_v44, 0.0 }
 0x295   :  { %492 = vst [vmem:[#allocation8 + $0x68] sm:$0xff] %v476_v45  ;;  %v508_v49 = vmul.f32 %v476_v45, %v1189_v3 }
 0x296   :  { %v422_v50 = vpop.f32.mrf.mxu1 }
 0x297   :  { %v441_v51 = vmul.f32 %v422_v50, %v1206_v12  ;;  %v517_v57 = vpack.c.bf16 %v508_v49, %v507_v48 }
 0x299   :  { %v461_v58 = vadd.f32 %v1240_v54, %v441_v51  ;;  %621 = vmatmul.bf16.gmra.mxu2 %v517_v57 }
 0x29b   :  { %v477_v59 = vmax.f32 %v461_v58, 0.0 }
 0x29d   :  { %493 = vst [vmem:[#allocation8 + $0x70] sm:$0xff] %v477_v59  ;;  %v509_v5 = vmul.f32 %v477_v59, %v1206_v12 }
 0x29e   :  { %v424_v62 = vpop.f32.mrf.mxu1 }
 0x29f   :  { %v442_v0 = vmul.f32 %v424_v62, %v1201_v10 }
 0x2a1   :  { %v462_v1 = vadd.f32 %v1240_v54, %v442_v0 }
 0x2a3   :  { %v478_v2 = vmax.f32 %v462_v1, 0.0 }
 0x2a5   :  { %494 = vst [vmem:[#allocation8 + $0x78] sm:$0xff] %v478_v2  ;;  %v510_v6 = vmul.f32 %v478_v2, %v1201_v10 }
 0x2a6   :  { %753 = dma.vmem_to_hbm [thread:$0]  %s746_s16, 2048, %s748_s20, [#allocation4], %s1006_s17, %s1006_s17, %s1007_s18  }
 0x2a7   :  { %v518_v8 = vpack.c.bf16 %v510_v6, %v509_v5 }
 0x2a9   :  { %626 = vmatmul.bf16.gmra.mxu2 %v518_v8 }
 0x2bc   :  { %v592_v9 = vpop.f32.mrf.mxu2 }
 0x2c4   :  { %v594_v11 = vpop.f32.mrf.mxu2 }
 0x2c5   :  { %v632_v13 = vpack.c.bf16 %v594_v11, %v592_v9 }
 0x2cc   :  { %v597_v15 = vpop.f32.mrf.mxu2 }
 0x2d4   :  { %v599_v16 = vpop.f32.mrf.mxu2 }
 0x2d5   :  { %v633_v17 = vpack.c.bf16 %v599_v16, %v597_v15 }
 0x2dc   :  { %v602_v18 = vpop.f32.mrf.mxu2 }
 0x2e4   :  { %v604_v19 = vpop.f32.mrf.mxu2 }
 0x2e5   :  { %v634_v21 = vpack.c.bf16 %v604_v19, %v602_v18 }
 0x2ec   :  { %v607_v22 = vpop.f32.mrf.mxu2 }
 0x2f4   :  { %v609_v23 = vpop.f32.mrf.mxu2 }
 0x2f5   :  { %v635_v54 = vpack.c.bf16 %v609_v23, %v607_v22 }
 0x2fc   :  { %v612_v24 = vpop.f32.mrf.mxu2 }
 0x304   :  { %v614_v27 = vpop.f32.mrf.mxu2 }
 0x305   :  { %v636_v43 = vpack.c.bf16 %v614_v27, %v612_v24 }
 0x30c   :  { %v617_v29 = vpop.f32.mrf.mxu2 }
 0x314   :  { %v619_v30 = vpop.f32.mrf.mxu2 }
 0x315   :  { %v637_v41 = vpack.c.bf16 %v619_v30, %v617_v29 }
 0x31c   :  { %v622_v31 = vpop.f32.mrf.mxu2 }
 0x324   :  { %v624_v33 = vpop.f32.mrf.mxu2 }
 0x325   :  { %v638_v38 = vpack.c.bf16 %v624_v33, %v622_v31 }
 0x32c   :  { %v627_v34 = vpop.f32.mrf.mxu2 }
 0x334   :  { %v629_v36 = vpop.f32.mrf.mxu2 }
 0x335   :  { %v639_v37 = vpack.c.bf16 %v629_v36, %v627_v34 }
 0x337   :  { %640 = vmatpush.bf16.msra.mxu3 %v639_v37 }
 0x33b   :  { %641 = vmatpush.bf16.msra.mxu3 %v638_v38 }
 0x33f   :  { %642 = vmatpush.bf16.msra.mxu3 %v637_v41 }
 0x343   :  { %643 = vmatpush.bf16.msra.mxu3 %v636_v43 }
 0x347   :  { %644 = vmatpush.bf16.msra.mxu3 %v635_v54 }
 0x34b   :  { %645 = vmatpush.bf16.msra.mxu3 %v634_v21 }
 0x34f   :  { %646 = vmatpush.bf16.msra.mxu3 %v633_v17 }
 0x353   :  { %647 = vmatpush.bf16.msra.mxu3 %v632_v13 }
 0x356   :  { %648 = vmatmul.bf16.vlgmr.msra.gmra.mxu3 %v1213_v55  ;;  %v1307_v55 = vld [vmem:[%s1353_s6] ss:$0 sm:$0xff]  ;;  %s1011_s6 = smov [#allocation9]  }
 0x357   :  { %s758_s7 = sshll.u32 %s1011_s6, 4  ;;  %s759_s7 = int_to_ptr.vmem [resolvable:$true] %s758_s7 }
 0x366   :  { %653 = vmatmul.bf16.gmra.mxu3 %v1216_v63 }
 0x376   :  { %658 = vmatmul.bf16.gmra.mxu3 %v1219_v7 }
 0x386   :  { %663 = vmatmul.bf16.gmra.mxu3 %v1222_v14 }
 0x396   :  { %668 = vmatmul.bf16.gmra.mxu3 %v1225_v20 }
 0x3a6   :  { %673 = vmatmul.bf16.gmra.mxu3 %v1228_v26 }
 0x3b6   :  { %678 = vmatmul.bf16.gmra.mxu3 %v1231_v40 }
 0x3c6   :  { %683 = vmatmul.bf16.gmra.mxu3 %v1234_v52 }
 0x3d9   :  { %v649_v63 = vpop.f32.mrf.mxu3 }
 0x3da   :  { %v689_v7 = vmul.f32 %v649_v63, %v1117_v25 }
 0x3dc   :  { %v709_v14 = vadd.f32 %v1307_v55, %v689_v7 }
 0x3de   :  { %725 = vst [vmem:[#allocation9] sm:$0xff] %v709_v14 }
 0x3e1   :  { %v651_v20 = vpop.f32.mrf.mxu3 }
 0x3e2   :  { %v690_v26 = vmul.f32 %v651_v20, %v1125_v28 }
 0x3e4   :  { %v710_v40 = vadd.f32 %v1307_v55, %v690_v26 }
 0x3e6   :  { %726 = vst [vmem:[#allocation9 + $0x8] sm:$0xff] %v710_v40 }
 0x3e9   :  { %v654_v52 = vpop.f32.mrf.mxu3 }
 0x3ea   :  { %v691_v44 = vmul.f32 %v654_v52, %v1129_v32 }
 0x3ec   :  { %v711_v45 = vadd.f32 %v1307_v55, %v691_v44 }
 0x3ee   :  { %727 = vst [vmem:[#allocation9 + $0x10] sm:$0xff] %v711_v45 }
 0x3f1   :  { %v656_v48 = vpop.f32.mrf.mxu3 }
 0x3f2   :  { %v692_v49 = vmul.f32 %v656_v48, %v1137_v35 }
 0x3f4   :  { %v712_v25 = vadd.f32 %v1307_v55, %v692_v49 }
 0x3f6   :  { %728 = vst [vmem:[#allocation9 + $0x18] sm:$0xff] %v712_v25 }
 0x3f9   :  { %v659_v50 = vpop.f32.mrf.mxu3 }
 0x3fa   :  { %v693_v51 = vmul.f32 %v659_v50, %v1141_v39 }
 0x3fc   :  { %v713_v28 = vadd.f32 %v1307_v55, %v693_v51 }
 0x3fe   :  { %729 = vst [vmem:[#allocation9 + $0x20] sm:$0xff] %v713_v28 }
 0x401   :  { %v661_v57 = vpop.f32.mrf.mxu3 }
 0x402   :  { %v694_v58 = vmul.f32 %v661_v57, %v1149_v42 }
 0x404   :  { %v714_v32 = vadd.f32 %v1307_v55, %v694_v58 }
 0x406   :  { %730 = vst [vmem:[#allocation9 + $0x28] sm:$0xff] %v714_v32 }
 0x409   :  { %v664_v59 = vpop.f32.mrf.mxu3 }
 0x40a   :  { %v695_v62 = vmul.f32 %v664_v59, %v1155_v47 }
 0x40c   :  { %v715_v35 = vadd.f32 %v1307_v55, %v695_v62 }
 0x40e   :  { %731 = vst [vmem:[#allocation9 + $0x30] sm:$0xff] %v715_v35 }
 0x411   :  { %v666_v0 = vpop.f32.mrf.mxu3 }
 0x412   :  { %v696_v1 = vmul.f32 %v666_v0, %v1153_v46 }
 0x414   :  { %v716_v39 = vadd.f32 %v1307_v55, %v696_v1 }
 0x416   :  { %732 = vst [vmem:[#allocation9 + $0x38] sm:$0xff] %v716_v39 }
 0x419   :  { %v669_v2 = vpop.f32.mrf.mxu3 }
 0x41a   :  { %v697_v5 = vmul.f32 %v669_v2, %v1173_v56 }
 0x41c   :  { %v717_v42 = vadd.f32 %v1307_v55, %v697_v5 }
 0x41e   :  { %733 = vst [vmem:[#allocation9 + $0x40] sm:$0xff] %v717_v42 }
 0x421   :  { %v671_v6 = vpop.f32.mrf.mxu3 }
 0x422   :  { %v698_v8 = vmul.f32 %v671_v6, %v1165_v53 }
 0x424   :  { %v718_v47 = vadd.f32 %v1307_v55, %v698_v8 }
 0x426   :  { %734 = vst [vmem:[#allocation9 + $0x48] sm:$0xff] %v718_v47 }
 0x429   :  { %v674_v9 = vpop.f32.mrf.mxu3 }
 0x42a   :  { %v699_v11 = vmul.f32 %v674_v9, %v1179_v61 }
 0x42c   :  { %v719_v46 = vadd.f32 %v1307_v55, %v699_v11 }
 0x42e   :  { %735 = vst [vmem:[#allocation9 + $0x50] sm:$0xff] %v719_v46 }
 0x431   :  { %v676_v13 = vpop.f32.mrf.mxu3 }
 0x432   :  { %v700_v15 = vmul.f32 %v676_v13, %v1177_v60 }
 0x434   :  { %v720_v56 = vadd.f32 %v1307_v55, %v700_v15 }
 0x436   :  { %736 = vst [vmem:[#allocation9 + $0x58] sm:$0xff] %v720_v56 }
 0x439   :  { %v679_v16 = vpop.f32.mrf.mxu3 }
 0x43a   :  { %v701_v17 = vmul.f32 %v679_v16, %v1191_v4 }
 0x43c   :  { %v721_v53 = vadd.f32 %v1307_v55, %v701_v17 }
 0x43e   :  { %737 = vst [vmem:[#allocation9 + $0x60] sm:$0xff] %v721_v53 }
 0x441   :  { %v681_v18 = vpop.f32.mrf.mxu3 }
 0x442   :  { %v702_v19 = vmul.f32 %v681_v18, %v1189_v3 }
 0x444   :  { %v722_v61 = vadd.f32 %v1307_v55, %v702_v19 }
 0x446   :  { %738 = vst [vmem:[#allocation9 + $0x68] sm:$0xff] %v722_v61 }
 0x449   :  { %v684_v21 = vpop.f32.mrf.mxu3 }
 0x44a   :  { %v703_v22 = vmul.f32 %v684_v21, %v1206_v12 }
 0x44c   :  { %v723_v60 = vadd.f32 %v1307_v55, %v703_v22 }
 0x44e   :  { %739 = vst [vmem:[#allocation9 + $0x70] sm:$0xff] %v723_v60 }
 0x451   :  { %v686_v23 = vpop.f32.mrf.mxu3 }
 0x452   :  { %v704_v4 = vmul.f32 %v686_v23, %v1201_v10 }
 0x454   :  { %v724_v3 = vadd.f32 %v1307_v55, %v704_v4 }
 0x456   :  { %740 = vst [vmem:[#allocation9 + $0x78] sm:$0xff] %v724_v3 }
 0x457   :  { %766 = dma.vmem_to_hbm [thread:$0]  %s759_s7, 2048, %s761_s24, [#allocation10], %s1006_s17, %s1006_s17, %s1007_s18  }
 0x458   :  { %998 = dma.done.wait [#allocation4], 2048  }
 0x459   :  { %999 = vsyncadd [#allocation4], 4294965248 }
 0x45a   :  { %1000 = dma.done.wait [#allocation10], 2048  }
 0x45b   :  { %1001 = vsyncadd [#allocation10], 4294965248 }
 0x45c   :  { %775 = vsyncpa [#allocation3], 1 }
 0x45d   :  { %776 = vsyncpa [#allocation6], 1 }
 0x45e   :  { %777 = vsyncpa [#allocation4], 1 }
 0x45f   :  { %778 = vsyncpa [#allocation10], 1 }

</bundles_post_ra>
